<compile_context>
chip_gen: v7x
topology: tpu7x:2x2x1
jax: 0.10.0
libtpu: 0.0.40
codegen_flags: <defaults>
</compile_context>

<pallas_src>
import functools
import random

import jax
import jax.numpy as jnp
from jax.experimental import pallas as pl
from jax.experimental.pallas import tpu as pltpu


def _conv_shift_kernel(x_ref, w_ref, o_ref, *, shift):
    """One batch block.

    x_ref: (BM, O, N, J)  bf16   -- input, already circularly rolled along N by `shift`
    w_ref: (3*J, 2*I)     bf16   -- rows l-major (l=0: tap o-1, l=1: o, l=2: o+1), cols k-major
    o_ref: (BM, O, N, I)  f32
    """
    X = x_ref[...]
    BM, O, N, J = X.shape
    KI = w_ref.shape[-1]
    I = KI // 2

    # Taps at o-1 / o+1 with zero padding.  O is a leading (non-sublane) axis of the block,
    # so these are aligned slab copies, not cross-sublane shuffles.
    zero = jnp.zeros((BM, 1, N, J), X.dtype)
    x_m1 = jnp.concatenate([zero, X[:, :-1]], axis=1)    # X[.., o-1, ..]
    x_p1 = jnp.concatenate([X[:, 1:], zero], axis=1)     # X[.., o+1, ..]

    # Single fused MXU matmul with K = 3*J (bf16 in, f32 accumulation):
    #   S[b, o, n, k*I + i] = sum_{l, j} X[b, o+l-1, n, j] * W[j, l, k, i]
    lhs = jnp.concatenate([x_m1, X, x_p1], axis=-1).reshape(BM * O * N, 3 * J)
    S = jnp.dot(lhs, w_ref[...], preferred_element_type=jnp.float32)
    S = S.reshape(BM, O, N, KI)
    S0 = S[..., :I]          # k = 0
    S1 = S[..., I:]          # k = 1

    # Circular roll along O between the two k taps (torch.roll over the flattened (o, k) axis).
    if shift == 1:
        # U[o] = S1[(o-1) % O] + S0[o]
        U = S0 + jnp.concatenate([S1[:, -1:], S1[:, :-1]], axis=1)
    else:
        # U[o] = S1[o] + S0[(o+1) % O]
        U = S1 + jnp.concatenate([S0[:, 1:], S0[:, :1]], axis=1)

    # The circular roll along N was already applied to the input in the wrapper,
    # so U is the final result for this block.
    o_ref[...] = U.astype(o_ref.dtype)


def _vmem_limit_bytes():
    # Large batch blocks need ~20-30 MiB of VMEM at the original shapes; raise the scoped
    # limit (v5e default is only 16 MiB) while staying safely below physical VMEM
    # (64 MiB per TensorCore on v7x, 128 MiB on v5e/v6e).
    try:
        cap = pltpu.get_tpu_info().vmem_capacity_bytes
    except Exception:
        cap = 128 * 1024 * 1024
    return min(64 * 1024 * 1024, (3 * cap) // 4)


@functools.partial(jax.jit, static_argnames=("shift",))
def kernel_generated_2_forward(x_nchw, w, shift):
    """x_nchw: (M, J, N, O) f32, w: (J, 3, 2, I) f32, shift: +/-1  ->  (M, I, O, N) f32."""
    M, J, N, O = x_nchw.shape
    I = w.shape[3]
    shift = int(shift)

    # Kernel-side input layout (M, O, N, J): channels on lanes, O leading so in-kernel
    # shifts along O are cheap.  The module's final circular n-roll is folded into this
    # relayout (XLA fuses roll + transpose + bf16 cast into one copy).
    # TODO(synk): if the caller can supply/accept channels-last tensors directly, these
    # wrapper-level HBM transposes disappear entirely.
    x_k = jnp.transpose(jnp.roll(x_nchw, shift, axis=2), (0, 3, 2, 1)).astype(jnp.bfloat16)
    # Fused weight (3*J, 2*I): rows l-major then j, columns k-major then i.
    w_k = jnp.transpose(w, (1, 0, 2, 3)).reshape(3 * J, 2 * I).astype(jnp.bfloat16)

    # Block several batch elements per grid step (amortizes ~0.35 us/step overhead, gives
    # multi-MB DMA tiles and 8x more MXU rows per invocation).  M=128 -> BM=8 -> 16 steps.
    bm = next(b for b in (8, 4, 2, 1) if M % b == 0)

    y_k = pl.pallas_call(
        functools.partial(_conv_shift_kernel, shift=shift),
        out_shape=jax.ShapeDtypeStruct((M, O, N, I), jnp.float32),
        grid=(M // bm,),
        in_specs=[
            pl.BlockSpec((bm, O, N, J), lambda m: (m, 0, 0, 0)),
            pl.BlockSpec((3 * J, 2 * I), lambda m: (0, 0)),
        ],
        out_specs=pl.BlockSpec((bm, O, N, I), lambda m: (m, 0, 0, 0)),
        compiler_params=pltpu.CompilerParams(
            dimension_semantics=("parallel",),
            vmem_limit_bytes=_vmem_limit_bytes(),
        ),
    )(x_k, w_k)

    # Back to the PyTorch output layout (M, I, O, N); I stays lane-dense inside the kernel.
    return jnp.transpose(y_k, (0, 3, 1, 2))


def _torch_like_reference(x_nchw, w, shift):
    """Direct jnp transcription of the PyTorch forward (unfold/einsum/roll), for checking."""
    M, J, N, O = x_nchw.shape
    I = w.shape[3]
    t2 = x_nchw.reshape(M, J * N, O, 1)
    pad = jnp.pad(t2[..., 0], ((0, 0), (0, 0), (1, 1)))
    # unfold (3,1) with padding (1,0): channel index = c*3 + k, position index = o
    patches = jnp.stack([pad[:, :, k:k + O] for k in range(3)], axis=2)   # (M, J*N, 3, O)
    t2u = patches.reshape(M, J * N * 3, O)
    t2r = t2u.reshape(M, J, N, 3, O)
    t2p = jnp.transpose(t2r, (0, 1, 2, 4, 3))                             # m j n o l
    t3 = jnp.einsum('mjnol,jlki->mnoki', t2p, w, precision='highest')
    t3 = jnp.transpose(t3, (0, 1, 2, 4, 3))                               # m n o i k
    t4 = jnp.transpose(t3, (0, 1, 3, 2, 4)).reshape(M, N, I, O * 2)       # m n i (o k)
    t4 = jnp.roll(t4, shift, axis=3)
    t4 = t4.reshape(M, N, I, O, 2).sum(axis=4)
    t5 = jnp.roll(t4, shift, axis=1)
    return jnp.transpose(t5, (0, 2, 3, 1))                                # m i o n


if __name__ == "__main__":
    # Small shapes consistent with the module structure (original: M=128, J=128, N=O=28, I=128).
    M, J, N, O, I = 2, 32, 8, 8, 32

    random.seed(0)
    shift_direction = (random.random() > 0.5) * 2 - 1   # deterministic +1/-1, like the module

    key = jax.random.PRNGKey(0)
    kx, kw = jax.random.split(key)
    x = jax.random.normal(kx, (M, J, N, O), dtype=jnp.float32)        # PyTorch NCHW input
    w = jax.random.normal(kw, (J, 3, 2, I), dtype=jnp.float32)        # ParameterList[0]

    y = kernel_generated_2_forward(x, w, int(shift_direction))
    y = jax.block_until_ready(y)

    y_ref = _torch_like_reference(x, w, shift_direction)
    rel_err = float(jnp.max(jnp.abs(y - y_ref)) / (jnp.max(jnp.abs(y_ref)) + 1e-6))
    assert y.shape == (M, I, O, N), y.shape
    assert rel_err < 1e-2, f"rel_err={rel_err}"

    print("KERNEL_OK")
</pallas_src>

<mosaic_0001>
module attributes {stable_mosaic.version = 11 : i64} {
  func.func @_conv_shift_kernel(%arg0: i32, %arg1: memref<2x8x8x32xbf16, #tpu.memory_space<vmem>>, %arg2: memref<96x64xbf16, #tpu.memory_space<vmem>>, %arg3: memref<2x8x8x32xf32, #tpu.memory_space<vmem>>) attributes {dimension_semantics = [#tpu.dimension_semantics<parallel>], iteration_bounds = array<i64: 1>, scalar_prefetch = 0 : i64, scratch_operands = 0 : i64, tpu.core_type = #tpu.core_type<tc>, window_params = [{transform_indices = @transform_0, window_bounds = array<i64: 2, 8, 8, 32>}, {pipeline_mode = #tpu.pipeline_mode<synchronous>, transform_indices = @transform_1, window_bounds = array<i64: 96, 64>}, {transform_indices = @transform_2, window_bounds = array<i64: 2, 8, 8, 32>}]} {
    %c0 = arith.constant 0 : index
    %c0_0 = arith.constant 0 : index
    %c0_1 = arith.constant 0 : index
    %c0_2 = arith.constant 0 : index
    %0 = vector.load %arg1[%c0, %c0_0, %c0_1, %c0_2] : memref<2x8x8x32xbf16, #tpu.memory_space<vmem>>, vector<2x8x8x32xbf16>
    %cst = arith.constant 0.000000e+00 : bf16
    %1 = vector.broadcast %cst : bf16 to vector<2x1x8x32xbf16>
    %2 = vector.extract_strided_slice %0 {offsets = [0, 0, 0, 0], sizes = [2, 7, 8, 32], strides = [1, 1, 1, 1]} : vector<2x8x8x32xbf16> to vector<2x7x8x32xbf16>
    %3 = tpu.concatenate %1, %2 in 1 : vector<2x1x8x32xbf16>, vector<2x7x8x32xbf16> -> vector<2x8x8x32xbf16>
    %4 = vector.extract_strided_slice %0 {offsets = [0, 1, 0, 0], sizes = [2, 7, 8, 32], strides = [1, 1, 1, 1]} : vector<2x8x8x32xbf16> to vector<2x7x8x32xbf16>
    %5 = tpu.concatenate %4, %1 in 1 : vector<2x7x8x32xbf16>, vector<2x1x8x32xbf16> -> vector<2x8x8x32xbf16>
    %6 = tpu.concatenate %3, %0, %5 in 3 : vector<2x8x8x32xbf16>, vector<2x8x8x32xbf16>, vector<2x8x8x32xbf16> -> vector<2x8x8x96xbf16>
    %7 = vector.shape_cast %6 : vector<2x8x8x96xbf16> to vector<128x96xbf16>
    %c0_3 = arith.constant 0 : index
    %c0_4 = arith.constant 0 : index
    %8 = vector.load %arg2[%c0_3, %c0_4] : memref<96x64xbf16, #tpu.memory_space<vmem>>, vector<96x64xbf16>
    %cst_5 = arith.constant dense<0.000000e+00> : vector<128x64xf32>
    %9 = tpu.matmul %7, %8, %cst_5 {dimension_numbers = #tpu.dot_dimension_numbers<[1], [0], [0], [1], [0, 0, 1, 1], [], []>} : vector<128x96xbf16>, vector<96x64xbf16>, vector<128x64xf32> -> vector<128x64xf32>
    %10 = vector.shape_cast %9 : vector<128x64xf32> to vector<2x8x8x64xf32>
    %11 = vector.extract_strided_slice %10 {offsets = [0, 0, 0, 0], sizes = [2, 8, 8, 32], strides = [1, 1, 1, 1]} : vector<2x8x8x64xf32> to vector<2x8x8x32xf32>
    %12 = vector.extract_strided_slice %10 {offsets = [0, 0, 0, 32], sizes = [2, 8, 8, 32], strides = [1, 1, 1, 1]} : vector<2x8x8x64xf32> to vector<2x8x8x32xf32>
    %13 = vector.extract_strided_slice %12 {offsets = [0, 7, 0, 0], sizes = [2, 1, 8, 32], strides = [1, 1, 1, 1]} : vector<2x8x8x32xf32> to vector<2x1x8x32xf32>
    %14 = vector.extract_strided_slice %12 {offsets = [0, 0, 0, 0], sizes = [2, 7, 8, 32], strides = [1, 1, 1, 1]} : vector<2x8x8x32xf32> to vector<2x7x8x32xf32>
    %15 = tpu.concatenate %13, %14 in 1 : vector<2x1x8x32xf32>, vector<2x7x8x32xf32> -> vector<2x8x8x32xf32>
    %16 = arith.addf %11, %15 : vector<2x8x8x32xf32>
    %c0_6 = arith.constant 0 : index
    %c0_7 = arith.constant 0 : index
    %c0_8 = arith.constant 0 : index
    %c0_9 = arith.constant 0 : index
    %17 = vector.load %arg3[%c0_6, %c0_7, %c0_8, %c0_9] : memref<2x8x8x32xf32, #tpu.memory_space<vmem>>, vector<2x8x8x32xf32>
    tpu.vector_store %arg3[%c0_6, %c0_7, %c0_8, %c0_9], %16 {strides = array<i32>} : memref<2x8x8x32xf32, #tpu.memory_space<vmem>>, vector<2x8x8x32xf32>,
    return
  }
  func.func @transform_0(%arg0: i32) -> (i32, i32, i32, i32) {
    %c0_i32 = arith.constant 0 : i32
    %c0_i32_0 = arith.constant 0 : i32
    %c0_i32_1 = arith.constant 0 : i32
    %c0_i32_2 = arith.constant 0 : i32
    return %arg0, %c0_i32, %c0_i32_0, %c0_i32_1 : i32, i32, i32, i32
  }
  func.func @transform_1(%arg0: i32) -> (i32, i32) {
    %c0_i32 = arith.constant 0 : i32
    %c0_i32_0 = arith.constant 0 : i32
    %c0_i32_1 = arith.constant 0 : i32
    return %c0_i32, %c0_i32_0 : i32, i32
  }
  func.func @transform_2(%arg0: i32) -> (i32, i32, i32, i32) {
    %c0_i32 = arith.constant 0 : i32
    %c0_i32_0 = arith.constant 0 : i32
    %c0_i32_1 = arith.constant 0 : i32
    %c0_i32_2 = arith.constant 0 : i32
    return %arg0, %c0_i32, %c0_i32_0, %c0_i32_1 : i32, i32, i32, i32
  }
}

</mosaic_0001>

<bundles_post_ra>
// kernel: kernel_generated_2_forward.1
= control target key start
LH: loop header
LB: loop body
LE: loop exit
PB: predicated region body
PF: predicated region fallthrough
CT: control target
= control target key end

     0   :  { %7 = vsyncpa [#allocation3], 0  ;;  %s1009_s0 = inlined_call_operand.hbm [shape: bf16[2,8,8,32], index: 0, kind: input, shape index: {}]   ;;  %s1010_s1 = inlined_call_operand.hbm [shape: bf16[96,64], index: 1, kind: input, shape index: {}]   ;;  %s1011_s2 = inlined_call_operand.hbm [shape: f32[2,8,8,32], index: 2, kind: output, shape index: {}]  }
   0x1   :  { %8 = vsyncpa [#allocation6], 0 }
   0x2   :  { %9 = vsyncpa [#allocation4], 0  ;;  %s771_s9 = smov [#allocation2]   ;;  %s699_s13 = scalar_lea.hbm %s1009_s0, 1024 }
   0x3   :  { %s15_s10 = sshll.u32 %s771_s9, 4  ;;  %p700_p0 = scmp.ne.s32.totalorder %s1009_s0, %s699_s13  ;;  %s16_s10 = int_to_ptr.vmem [resolvable:$true] %s15_s10 }
   0x4   :  { %p703_p1 = scmp.lt.u32.totalorder %s699_s13, %s1009_s0 }
   0x6   :  { %p705_p2 = pnand %p703_p1, %p700_p0 }
   0x8   :  { %708 = shalt.err (!%p705_p2)
}
   0x9   :  { %s709_s18 = scalar_lea.vmem %s16_s10, 1024  ;;  %p714_p4 = scmp.lt.s32.totalorder %s16_s10, %s16_s10 }
   0xa   :  { %p710_p3 = scmp.ne.s32.totalorder %s16_s10, %s709_s18  ;;  %p715_p5 = scmp.lt.s32.totalorder %s709_s18, %s709_s18 }
   0xc   :  { %p716_p6 = por %p715_p5, %p714_p4 }
   0xe   :  { %p717_p7 = pnand %p716_p6, %p710_p3 }
  0x10   :  { %720 = shalt.err (!%p717_p7)
}
  0x11   :  { %s772_s19 = smov 64   ;;  %s773_s20 = smov 4  }
  0x12   :  { %21 = dma.hbm_to_vmem [thread:$0]  %s1009_s0, 1024, %s16_s10, [#allocation3], %s772_s19, %s772_s19, %s773_s20  }
  0x13   :  { %s774_s23 = smov [#allocation5]   ;;  %s721_s27 = scalar_lea.hbm %s1010_s1, 768 }
  0x14   :  { %s27_s24 = sshll.u32 %s774_s23, 4  ;;  %p722_p8 = scmp.ne.s32.totalorder %s1010_s1, %s721_s27  ;;  %s28_s24 = int_to_ptr.vmem [resolvable:$true] %s27_s24 }
  0x15   :  { %p725_p9 = scmp.lt.u32.totalorder %s721_s27, %s1010_s1 }
  0x17   :  { %p727_p10 = pnand %p725_p9, %p722_p8 }
  0x19   :  { %730 = shalt.err (!%p727_p10)
}
  0x1a   :  { %s731_s4 = scalar_lea.vmem %s28_s24, 768  ;;  %p736_p12 = scmp.lt.s32.totalorder %s28_s24, %s28_s24 }
  0x1b   :  { %p732_p11 = scmp.ne.s32.totalorder %s28_s24, %s731_s4  ;;  %p737_p13 = scmp.lt.s32.totalorder %s731_s4, %s731_s4 }
  0x1d   :  { %p738_p0 = por %p737_p13, %p736_p12 }
  0x1f   :  { %p739_p1 = pnand %p738_p0, %p732_p11 }
  0x21   :  { %742 = shalt.err (!%p739_p1)
}
  0x22   :  { %33 = dma.hbm_to_vmem [thread:$0]  %s1010_s1, 768, %s28_s24, [#allocation6], %s772_s19, %s772_s19, %s773_s20  }
  0x23   :  { %765 = dma.done.wait [#allocation3], 1024  }
  0x24   :  { %766 = vsyncadd [#allocation3], 4294966272 }
  0x25   :  { %767 = dma.done.wait [#allocation6], 768  }
  0x26   :  { %768 = vsyncadd [#allocation6], 4294966528  ;;  %v824_v0 = vld [vmem:[#allocation2 + $0x20] sm:$0xf]  ;;  %v828_v2 = vld [vmem:[#allocation2 + $0x24] sm:$0xf] }
  0x27   :  { %v826_v1 = vld [vmem:[#allocation2] sm:$0xf]  ;;  %v582_v3 = vcombine.low %v824_v0, %v824_v0  ;;  %v834_v5 = vld [vmem:[#allocation2 + $0x4] sm:$0xf]  ;;  %s775_s6 = smov 32   ;;  %v583_v6 = vcombine.low %v828_v2, %v828_v2  ;;  %v694_v14 = vld [vmem:[#allocation5 + $0x8] sm:$0xff]  }
  0x28   :  { %v574_v4 = vcombine.low %v826_v1, %v826_v1  ;;  %v575_v7 = vcombine.low %v834_v5, %v834_v5  ;;  %v842_v8 = vld [vmem:[#allocation2 + $0xc] sm:$0xf]  ;;  %v844_v9 = vld [vmem:[#allocation2 + $0x8] sm:$0xf]  ;;  %v693_v11 = vld [vmem:[#allocation5] sm:$0xff]   ;;  %v776_v36 = vmov 0  }
  0x29   :  { %121 = vrot.lane.b32.xlu1 %v582_v3, %s775_s6  ;;  %v846_v10 = vld [vmem:[#allocation2 + $0x2c] sm:$0xf]  ;;  %v577_v12 = vcombine.low %v842_v8, %v842_v8  ;;  %v576_v13 = vcombine.low %v844_v9, %v844_v9  ;;  %v854_v15 = vld [vmem:[#allocation2 + $0x28] sm:$0xf]  ;;  %627 = vmatprep.subr.bf16.mxu0 %v693_v11  ;;  %v695_v16 = vld [vmem:[#allocation5 + $0x10] sm:$0xff]   ;;  %v590_v37 = vcombine.low %v776_v36, %v776_v36  ;;  %vm170_vm0 = vcmask 261120  }
  0x2a   :  { %105 = vrot.lane.b32.xlu0 %v574_v4, %s775_s6  ;;  %655 = vmatprep.subr.bf16.mxu1 %v693_v11  ;;  %v585_v17 = vcombine.low %v846_v10, %v846_v10  ;;  %v584_v18 = vcombine.low %v854_v15, %v854_v15  ;;  %v696_v19 = vld [vmem:[#allocation5 + $0x18] sm:$0xff]   ;;  %v697_v20 = vld [vmem:[#allocation5 + $0x20] sm:$0xff]   ;;  %v866_v21 = vld [vmem:[#allocation2 + $0x10] sm:$0xf]  ;;  %vm218_vm1 = vcmask 523264   ;;  %vm338_vm2 = vcmask 785408  }
  0x2b   :  { %628 = vmatpush3.bf16.msra.mxu0 %v693_v11  ;;  %661 = vmatpush3.bf16.msra.mxu1 %v693_v11  ;;  %v698_v22 = vld [vmem:[#allocation5 + $0x28] sm:$0xff]   ;;  %v578_v23 = vcombine.low %v866_v21, %v866_v21  ;;  %v872_v24 = vld [vmem:[#allocation2 + $0x30] sm:$0xf]  ;;  %v878_v26 = vld [vmem:[#allocation2 + $0x14] sm:$0xf]  ;;  %s777_s1 = smov 96  }
  0x2c   :  { %629 = vmatprep.subr.bf16.mxu0 %v694_v14  ;;  %656 = vmatprep.subr.bf16.mxu1 %v694_v14  ;;  %v586_v25 = vcombine.low %v872_v24, %v872_v24  ;;  %v579_v27 = vcombine.low %v878_v26, %v878_v26  ;;  %v884_v28 = vld [vmem:[#allocation2 + $0x34] sm:$0xf]  ;;  %v890_v30 = vld [vmem:[#allocation2 + $0x18] sm:$0xf]  ;;  %v689_v31 = vld [vmem:[#allocation2 + $0x1c] ss:$0 sps:$4 sm:$0xff]  }
  0x2d   :  { %123 = vrot.lane.b32.xlu1 %v583_v6, %s775_s6  ;;  %v587_v29 = vcombine.low %v884_v28, %v884_v28  ;;  %v580_v32 = vcombine.low %v890_v30, %v890_v30  ;;  %v896_v33 = vld [vmem:[#allocation2 + $0x38] sm:$0xf]  ;;  %v691_v34 = vld [vmem:[#allocation2 + $0x3c] ss:$0 sps:$4 sm:$0xff]   ;;  %s778_s7 = smov [#allocation7]  }
  0x2e   :  { %107 = vrot.lane.b32.xlu0 %v575_v7, %s775_s6  ;;  %v588_v35 = vcombine.low %v896_v33, %v896_v33  ;;  %s561_s8 = sshll.u32 %s778_s7, 4  ;;  %s562_s8 = int_to_ptr.vmem [resolvable:$true] %s561_s8 }
  0x2f   :  { %630 = vmatpush3.bf16.msra.mxu0 %v694_v14  ;;  %662 = vmatpush3.bf16.msra.mxu1 %v694_v14  ;;  %s743_s9 = scalar_lea.vmem %s562_s8, 2048  ;;  %p748_p3 = scmp.lt.s32.totalorder %s562_s8, %s562_s8 }
  0x30   :  { %631 = vmatprep.subr.bf16.mxu0 %v695_v16  ;;  %657 = vmatprep.subr.bf16.mxu1 %v695_v16  ;;  %p744_p2 = scmp.ne.s32.totalorder %s562_s8, %s743_s9  ;;  %p749_p4 = scmp.lt.s32.totalorder %s743_s9, %s743_s9 }
  0x31   :  { %111 = vrot.lane.b32.xlu1 %v577_v12, %s775_s6 }
  0x32   :  { %109 = vrot.lane.b32.xlu0 %v576_v13, %s775_s6  ;;  %p750_p5 = por %p749_p4, %p748_p3 }
  0x33   :  { %632 = vmatpush3.bf16.msra.mxu0 %v695_v16  ;;  %663 = vmatpush3.bf16.msra.mxu1 %v695_v16 }
  0x34   :  { %633 = vmatprep.subr.bf16.mxu0 %v696_v19  ;;  %658 = vmatprep.subr.bf16.mxu1 %v696_v19  ;;  %p751_p6 = pnand %p750_p5, %p744_p2 }
  0x35   :  { %127 = vrot.lane.b32.xlu1 %v585_v17, %s775_s6 }
  0x36   :  { %125 = vrot.lane.b32.xlu0 %v584_v18, %s775_s6 }
  0x37   :  { %634 = vmatpush3.bf16.msra.mxu0 %v696_v19  ;;  %664 = vmatpush3.bf16.msra.mxu1 %v696_v19 }
  0x38   :  { %635 = vmatprep.subr.bf16.mxu0 %v697_v20  ;;  %659 = vmatprep.subr.bf16.mxu1 %v697_v20 }
  0x39   :  { %142 = vrot.lane.b32.xlu1 %v576_v13, %s772_s19 }
  0x3a   :  { %140 = vrot.lane.b32.xlu0 %v575_v7, %s772_s19 }
  0x3b   :  { %636 = vmatpush3.bf16.msra.mxu0 %v697_v20  ;;  %665 = vmatpush3.bf16.msra.mxu1 %v697_v20 }
  0x3c   :  { %637 = vmatprep.subr.bf16.mxu0 %v698_v22  ;;  %660 = vmatprep.subr.bf16.mxu1 %v698_v22 }
  0x3d   :  { %158 = vrot.lane.b32.xlu1 %v584_v18, %s772_s19 }
  0x3e   :  { %156 = vrot.lane.b32.xlu0 %v583_v6, %s772_s19 }
  0x3f   :  { %638 = vmatpush3.bf16.msra.mxu0 %v698_v22  ;;  %666 = vmatpush3.bf16.msra.mxu1 %v698_v22 }
  0x41   :  { %146 = vrot.lane.b32.xlu1 %v578_v23, %s772_s19 }
  0x42   :  { %144 = vrot.lane.b32.xlu0 %v577_v12, %s772_s19 }
  0x45   :  { %162 = vrot.lane.b32.xlu1 %v586_v25, %s772_s19 }
  0x46   :  { %160 = vrot.lane.b32.xlu0 %v585_v17, %s772_s19 }
  0x49   :  { %115 = vrot.lane.b32.xlu1 %v579_v27, %s775_s6 }
  0x4a   :  { %113 = vrot.lane.b32.xlu0 %v578_v23, %s775_s6 }
  0x4d   :  { %131 = vrot.lane.b32.xlu1 %v587_v29, %s775_s6 }
  0x4e   :  { %129 = vrot.lane.b32.xlu0 %v586_v25, %s775_s6 }
  0x51   :  { %119 = vrot.lane.b32.xlu1 %v689_v31, %s775_s6 }
  0x52   :  { %117 = vrot.lane.b32.xlu0 %v580_v32, %s775_s6 }
  0x55   :  { %135 = vrot.lane.b32.xlu1 %v691_v34, %s775_s6 }
  0x56   :  { %133 = vrot.lane.b32.xlu0 %v588_v35, %s775_s6 }
  0x59   :  { %150 = vrot.lane.b32.xlu1 %v580_v32, %s772_s19 }
  0x5a   :  { %148 = vrot.lane.b32.xlu0 %v579_v27, %s772_s19 }
  0x5d   :  { %166 = vrot.lane.b32.xlu1 %v588_v35, %s772_s19 }
  0x5e   :  { %164 = vrot.lane.b32.xlu0 %v587_v29, %s772_s19 }
  0x61   :  { %154 = vrot.lane.b32.xlu1 %v590_v37, %s772_s19 }
  0x62   :  { %152 = vrot.lane.b32.xlu0 %v689_v31, %s772_s19 }
  0x66   :  { %168 = vrot.lane.b32.xlu0 %v691_v34, %s772_s19 }
  0x9b   :  { %v122_v38 = vpop.permute.xlu1 %121 }
  0x9c   :  { %v106_v39 = vpop.permute.xlu0 %105  ;;  %v196_v53 = vsel %vm170_vm0, 0, %v122_v38 }
  0x9d   :  { %v173_v46 = vsel %vm170_vm0, 0, %v106_v39 }
  0x9f   :  { %v124_v40 = vpop.permute.xlu1 %123 }
  0xa0   :  { %v108_v41 = vpop.permute.xlu0 %107  ;;  %v199_v54 = vsel %vm170_vm0, %v824_v0, %v124_v40 }
  0xa1   :  { %v176_v47 = vsel %vm170_vm0, %v826_v1, %v108_v41 }
  0xa3   :  { %v112_v42 = vpop.permute.xlu1 %111 }
  0xa4   :  { %v110_v43 = vpop.permute.xlu0 %109  ;;  %v182_v60 = vsel %vm170_vm0, %v844_v9, %v112_v42 }
  0xa5   :  { %v179_v61 = vsel %vm170_vm0, %v834_v5, %v110_v43 }
  0xa7   :  { %v128_v44 = vpop.permute.xlu1 %127 }
  0xa8   :  { %v126_v45 = vpop.permute.xlu0 %125  ;;  %v205_v4 = vsel %vm170_vm0, %v854_v15, %v128_v44 }
  0xa9   :  { %v202_v6 = vsel %vm170_vm0, %v828_v2, %v126_v45 }
  0xab   :  { %v143_v48 = vpop.permute.xlu1 %142 }
  0xac   :  { %v141_v49 = vpop.permute.xlu0 %140  ;;  %v222_v50 = vsel %vm218_vm1, %v176_v47, %v143_v48 }
  0xad   :  { %v220_v51 = vsel %vm218_vm1, %v173_v46, %v141_v49 }
  0xae   :  { %v591_v52 = vcombine.low %v220_v51, %v222_v50 }
  0xaf   :  { %v159_v55 = vpop.permute.xlu1 %158 }
  0xb0   :  { %639 = vmatprep.mubr.msk.bf16.mxu0 %vm338_vm2, %v591_v52  ;;  %v157_v56 = vpop.permute.xlu0 %156  ;;  %v238_v57 = vsel %vm218_vm1, %v199_v54, %v159_v55 }
  0xb1   :  { %v236_v58 = vsel %vm218_vm1, %v196_v53, %v157_v56 }
  0xb2   :  { %v595_v59 = vcombine.low %v236_v58, %v238_v57 }
  0xb3   :  { %v147_v62 = vpop.permute.xlu1 %146 }
  0xb4   :  { %647 = vmatprep.mubr.msk.bf16.mxu1 %vm338_vm2, %v595_v59  ;;  %v145_v63 = vpop.permute.xlu0 %144  ;;  %v226_v0 = vsel %vm218_vm1, %v182_v60, %v147_v62 }
  0xb5   :  { %v224_v1 = vsel %vm218_vm1, %v179_v61, %v145_v63 }
  0xb6   :  { %v592_v3 = vcombine.low %v224_v1, %v226_v0 }
  0xb7   :  { %v163_v7 = vpop.permute.xlu1 %162 }
  0xb8   :  { %640 = vmatmul.mubr.msk.bf16.vlgmr.msra.gmra.mrb[0].mxu0 %vm338_vm2, %v592_v3  ;;  %v161_v9 = vpop.permute.xlu0 %160  ;;  %v242_v5 = vsel %vm218_vm1, %v205_v4, %v163_v7 }
  0xb9   :  { %v240_v11 = vsel %vm218_vm1, %v202_v6, %v161_v9 }
  0xba   :  { %v596_v12 = vcombine.low %v240_v11, %v242_v5 }
  0xbb   :  { %v116_v13 = vpop.permute.xlu1 %115 }
  0xbc   :  { %648 = vmatmul.mubr.msk.bf16.vlgmr.msra.gmra.mrb[0].mxu1 %vm338_vm2, %v596_v12  ;;  %v114_v14 = vpop.permute.xlu0 %113  ;;  %v188_v2 = vsel %vm170_vm0, %v866_v21, %v116_v13 }
  0xbd   :  { %v185_v22 = vsel %vm170_vm0, %v842_v8, %v114_v14 }
  0xbf   :  { %v132_v16 = vpop.permute.xlu1 %131 }
  0xc0   :  { %v130_v17 = vpop.permute.xlu0 %129  ;;  %v211_v32 = vsel %vm170_vm0, %v872_v24, %v132_v16 }
  0xc1   :  { %v208_v34 = vsel %vm170_vm0, %v846_v10, %v130_v17 }
  0xc3   :  { %v120_v18 = vpop.permute.xlu1 %119 }
  0xc4   :  { %v118_v15 = vpop.permute.xlu0 %117  ;;  %v194_v38 = vsel %vm170_vm0, %v890_v30, %v120_v18 }
  0xc5   :  { %v191_v39 = vsel %vm170_vm0, %v878_v26, %v118_v15 }
  0xc7   :  { %v136_v19 = vpop.permute.xlu1 %135 }
  0xc8   :  { %v134_v20 = vpop.permute.xlu0 %133  ;;  %v217_v43 = vsel %vm170_vm0, %v896_v33, %v136_v19 }
  0xc9   :  { %v214_v44 = vsel %vm170_vm0, %v884_v28, %v134_v20 }
  0xcb   :  { %v151_v23 = vpop.permute.xlu1 %150 }
  0xcc   :  { %v149_v25 = vpop.permute.xlu0 %148  ;;  %v230_v27 = vsel %vm218_vm1, %v188_v2, %v151_v23 }
  0xcd   :  { %v228_v29 = vsel %vm218_vm1, %v185_v22, %v149_v25 }
  0xce   :  { %v593_v31 = vcombine.low %v228_v29, %v230_v27 }
  0xcf   :  { %v167_v35 = vpop.permute.xlu1 %166 }
  0xd0   :  { %643 = vmatprep.mubr.msk.bf16.mxu0 %vm338_vm2, %v593_v31  ;;  %v165_v21 = vpop.permute.xlu0 %164  ;;  %v246_v36 = vsel %vm218_vm1, %v211_v32, %v167_v35 }
  0xd1   :  { %v244_v8 = vsel %vm218_vm1, %v208_v34, %v165_v21 }
  0xd2   :  { %v597_v37 = vcombine.low %v244_v8, %v246_v36 }
  0xd3   :  { %v155_v40 = vpop.permute.xlu1 %154 }
  0xd4   :  { %651 = vmatprep.mubr.msk.bf16.mxu1 %vm338_vm2, %v597_v37  ;;  %v153_v24 = vpop.permute.xlu0 %152  ;;  %v234_v10 = vsel %vm218_vm1, %v194_v38, %v155_v40  ;;  %v249_v26 = vsel %vm218_vm1, %v217_v43, %v155_v40 }
  0xd5   :  { %v232_v41 = vsel %vm218_vm1, %v191_v39, %v153_v24 }
  0xd6   :  { %v594_v42 = vcombine.low %v232_v41, %v234_v10 }
  0xd8   :  { %644 = vmatmul.mubr.msk.bf16.gmra.mrb[4].mxu0 %vm338_vm2, %v594_v42  ;;  %v169_v30 = vpop.permute.xlu0 %168 }
  0xd9   :  { %v248_v45 = vsel %vm218_vm1, %v214_v44, %v169_v30 }
  0xda   :  { %v598_v46 = vcombine.low %v248_v45, %v249_v26 }
  0xdc   :  { %652 = vmatmul.mubr.msk.bf16.gmra.mrb[4].mxu1 %vm338_vm2, %v598_v46 }
 0x18b   :  { %v641_v47 = vpop.f32.mrb[0].mxu0 }
 0x18c   :  { %482 = vrot.lane.b32.xlu0 %v641_v47, %s777_s1  ;;  %v397_v48 = vpop.f32.mrb[1].mxu0 }
 0x18d   :  { %v642_v49 = vpop.f32.mrb[2].mxu0 }
 0x18e   :  { %484 = vrot.lane.b32.xlu1 %v642_v49, %s777_s1  ;;  %v400_v33 = vpop.f32.mrb[3].mxu0 }
 0x18f   :  { %v649_v28 = vpop.f32.mrb[0].mxu1 }
 0x190   :  { %498 = vrot.lane.b32.xlu0 %v649_v28, %s777_s1  ;;  %v429_v50 = vpop.f32.mrb[1].mxu1 }
 0x191   :  { %v650_v51 = vpop.f32.mrb[2].mxu1 }
 0x192   :  { %500 = vrot.lane.b32.xlu1 %v650_v51, %s777_s1  ;;  %v432_v52 = vpop.f32.mrb[3].mxu1 }
 0x194   :  { %478 = vrot.lane.b32.xlu0 %v397_v48, %s777_s1 }
 0x196   :  { %480 = vrot.lane.b32.xlu1 %v400_v33, %s777_s1 }
 0x198   :  { %494 = vrot.lane.b32.xlu0 %v429_v50, %s777_s1 }
 0x19a   :  { %496 = vrot.lane.b32.xlu1 %v432_v52, %s777_s1 }
 0x1ab   :  { %v645_v53 = vpop.f32.mrb[4].mxu0 }
 0x1ac   :  { %490 = vrot.lane.b32.xlu0 %v645_v53, %s777_s1  ;;  %v413_v54 = vpop.f32.mrb[5].mxu0 }
 0x1ad   :  { %v646_v55 = vpop.f32.mrb[6].mxu0 }
 0x1ae   :  { %476 = vrot.lane.b32.xlu1 %v646_v55, %s777_s1  ;;  %v416_v56 = vpop.f32.mrb[7].mxu0 }
 0x1af   :  { %v653_v57 = vpop.f32.mrb[4].mxu1 }
 0x1b0   :  { %486 = vrot.lane.b32.xlu0 %v413_v54, %s777_s1  ;;  %v445_v58 = vpop.f32.mrb[5].mxu1 }
 0x1b1   :  { %v654_v59 = vpop.f32.mrb[6].mxu1 }
 0x1b2   :  { %492 = vrot.lane.b32.xlu1 %v654_v59, %s777_s1  ;;  %v448_v60 = vpop.f32.mrb[7].mxu1 }
 0x1b4   :  { %502 = vrot.lane.b32.xlu0 %v445_v58, %s777_s1 }
 0x1b6   :  { %488 = vrot.lane.b32.xlu1 %v416_v56, %s777_s1 }
 0x1b8   :  { %506 = vrot.lane.b32.xlu0 %v653_v57, %s777_s1 }
 0x1ba   :  { %504 = vrot.lane.b32.xlu1 %v448_v60, %s777_s1 }
 0x1fe   :  { %v483_v61 = vpop.permute.xlu0 %482 }
 0x1ff   :  { %v527_v62 = vadd.f32 %v642_v49, %v483_v61 }
 0x200   :  { %v485_v63 = vpop.permute.xlu1 %484 }
 0x201   :  { %543 = vst.msk [vmem:[#allocation7 + $0x18] sm:$0xff] %vm170_vm0, %v527_v62  ;;  %v528_v0 = vadd.f32 %v485_v63, %v413_v54 }
 0x202   :  { %v499_v1 = vpop.permute.xlu0 %498 }
 0x203   :  { %544 = vst.msk [vmem:[#allocation7 + $0x20] sm:$0xff] %vm170_vm0, %v528_v0  ;;  %v535_v3 = vadd.f32 %v650_v51, %v499_v1 }
 0x204   :  { %v501_v4 = vpop.permute.xlu1 %500 }
 0x205   :  { %551 = vst.msk [vmem:[#allocation7 + $0x58] sm:$0xff] %vm170_vm0, %v535_v3  ;;  %v536_v6 = vadd.f32 %v501_v4, %v445_v58 }
 0x206   :  { %v479_v7 = vpop.permute.xlu0 %478 }
 0x207   :  { %552 = vst.msk [vmem:[#allocation7 + $0x60] sm:$0xff] %vm170_vm0, %v536_v6  ;;  %v525_v9 = vadd.f32 %v479_v7, %v400_v33 }
 0x208   :  { %v481_v5 = vpop.permute.xlu1 %480 }
 0x209   :  { %541 = vst.msk [vmem:[#allocation7 + $0x8] sm:$0xff] %vm170_vm0, %v525_v9  ;;  %v526_v11 = vadd.f32 %v641_v47, %v481_v5 }
 0x20a   :  { %v495_v12 = vpop.permute.xlu0 %494 }
 0x20b   :  { %542 = vst.msk [vmem:[#allocation7 + $0x10] sm:$0xff] %vm170_vm0, %v526_v11  ;;  %v533_v13 = vadd.f32 %v495_v12, %v432_v52 }
 0x20c   :  { %v497_v14 = vpop.permute.xlu1 %496 }
 0x20d   :  { %549 = vst.msk [vmem:[#allocation7 + $0x48] sm:$0xff] %vm170_vm0, %v533_v13  ;;  %v534_v16 = vadd.f32 %v649_v28, %v497_v14 }
 0x20f   :  { %550 = vst.msk [vmem:[#allocation7 + $0x50] sm:$0xff] %vm170_vm0, %v534_v16 }
 0x21e   :  { %v491_v17 = vpop.permute.xlu0 %490 }
 0x21f   :  { %v531_v18 = vadd.f32 %v646_v55, %v491_v17 }
 0x220   :  { %v477_v15 = vpop.permute.xlu1 %476 }
 0x221   :  { %547 = vst.msk [vmem:[#allocation7 + $0x38] sm:$0xff] %vm170_vm0, %v531_v18  ;;  %v524_v19 = vadd.f32 %v477_v15, %v397_v48 }
 0x222   :  { %v487_v20 = vpop.permute.xlu0 %486 }
 0x223   :  { %540 = vst.msk [vmem:[#allocation7] sm:$0xff] %vm170_vm0, %v524_v19  ;;  %v529_v2 = vadd.f32 %v487_v20, %v416_v56 }
 0x224   :  { %v493_v22 = vpop.permute.xlu1 %492 }
 0x225   :  { %545 = vst.msk [vmem:[#allocation7 + $0x28] sm:$0xff] %vm170_vm0, %v529_v2  ;;  %v532_v23 = vadd.f32 %v493_v22, %v429_v50 }
 0x226   :  { %v503_v25 = vpop.permute.xlu0 %502 }
 0x227   :  { %548 = vst.msk [vmem:[#allocation7 + $0x40] sm:$0xff] %vm170_vm0, %v532_v23  ;;  %v537_v27 = vadd.f32 %v503_v25, %v448_v60 }
 0x228   :  { %v489_v29 = vpop.permute.xlu1 %488 }
 0x229   :  { %553 = vst.msk [vmem:[#allocation7 + $0x68] sm:$0xff] %vm170_vm0, %v537_v27  ;;  %v530_v31 = vadd.f32 %v645_v53, %v489_v29 }
 0x22a   :  { %v507_v32 = vpop.permute.xlu0 %506 }
 0x22b   :  { %546 = vst.msk [vmem:[#allocation7 + $0x30] sm:$0xff] %vm170_vm0, %v530_v31  ;;  %v539_v34 = vadd.f32 %v654_v59, %v507_v32 }
 0x22c   :  { %v505_v35 = vpop.permute.xlu1 %504 }
 0x22d   :  { %555 = vst.msk [vmem:[#allocation7 + $0x78] sm:$0xff] %vm170_vm0, %v539_v34  ;;  %v538_v21 = vadd.f32 %v653_v57, %v505_v35 }
 0x22f   :  { %554 = vst.msk [vmem:[#allocation7 + $0x70] sm:$0xff] %vm170_vm0, %v538_v21 }
 0x230   :  { %754 = shalt.err (!%p751_p6)
}
 0x231   :  { %s755_s12 = scalar_lea.hbm %s1011_s2, 2048 }
 0x232   :  { %p756_p7 = scmp.ne.s32.totalorder %s1011_s2, %s755_s12  ;;  %p759_p8 = scmp.lt.u32.totalorder %s755_s12, %s1011_s2 }
 0x234   :  { %p761_p9 = pnand %p759_p8, %p756_p7 }
 0x236   :  { %764 = shalt.err (!%p761_p9)
}
 0x237   :  { %s779_s17 = smov 128   ;;  %s780_s18 = smov 8  }
 0x238   :  { %567 = dma.vmem_to_hbm [thread:$0]  %s562_s8, 2048, %s1011_s2, [#allocation4], %s779_s17, %s779_s17, %s780_s18  }
 0x239   :  { %769 = dma.done.wait [#allocation4], 2048  }
 0x23a   :  { %770 = vsyncadd [#allocation4], 4294965248 }
 0x23b   :  { %571 = vsyncpa [#allocation3], 1 }
 0x23c   :  { %572 = vsyncpa [#allocation6], 1 }
 0x23d   :  { %573 = vsyncpa [#allocation4], 1 }

</bundles_post_ra>
